<compile_context>
chip_gen: v7x
topology: tpu7x:2x2x1
jax: 0.10.0
libtpu: 0.0.40
codegen_flags: <defaults>
</compile_context>

<pallas_src>
import math

import jax
import jax.numpy as jnp
import numpy as np
from jax.experimental import pallas as pl
from jax.experimental.pallas import tpu as pltpu


# ----------------------------- helpers ------------------------------------- #

def _layer_norm(x, gamma, beta, eps=1e-5):
    mu = jnp.mean(x, axis=-1, keepdims=True)
    var = jnp.mean((x - mu) ** 2, axis=-1, keepdims=True)
    return (x - mu) * jax.lax.rsqrt(var + eps) * gamma + beta


def _pick_tile(s, target=256):
    """Largest tile <= target dividing S; prefer multiples of 32/16 (bf16 packing)."""
    if s <= target:
        return s
    for step in (32, 16, 8):
        for t in range(target - (target % step), step - 1, -step):
            if t > 0 and s % t == 0:
                return t
    return s


def _nbytes(shape, dtype):
    return int(np.prod(shape)) * jnp.dtype(dtype).itemsize


def _vmem_capacity_bytes():
    try:
        info = pltpu.get_tpu_info()
        cap = getattr(info, "vmem_capacity_bytes", None)
        if cap:
            return int(cap)
    except Exception:
        pass
    return 64 << 20  # conservative fallback = v7x physical VMEM per TensorCore


def _vmem_limit(block_bytes):
    # block_bytes already includes the default double-buffering of streamed
    # blocks; add slack for compiler-internal scratch, cap at ~85% of physical
    # VMEM (≈108 MiB on v5e/v6e, ≈54 MiB on v7x).
    cap = _vmem_capacity_bytes()
    want = int(block_bytes) + (8 << 20)
    return int(min(max(want, 32 << 20), int(0.85 * cap)))


# ----------------------------- kernel 1: QKV -------------------------------- #

def _qkv_kernel(x_ref, wq_ref, bq_ref, wk_ref, bk_ref, wv_ref, bv_ref,
                q_ref, k_ref, v_ref):
    H, hd = q_ref.shape[1], q_ref.shape[3]
    x = x_ref[0].astype(jnp.bfloat16)                        # (tq, D)
    scale = 1.0 / math.sqrt(hd)

    def proj(w_ref, b_ref):
        return (jnp.dot(x, w_ref[...], preferred_element_type=jnp.float32)
                + b_ref[...])

    # Fold 1/sqrt(head_dim) into Q once (S*D VPU muls instead of H*S^2 later).
    qp = (proj(wq_ref, bq_ref) * scale).astype(q_ref.dtype)  # (tq, D)
    kp = proj(wk_ref, bk_ref).astype(k_ref.dtype)
    vp = proj(wv_ref, bv_ref).astype(v_ref.dtype)

    # Emit head-major (H, tq, hd) directly: per-head static lane slices, no
    # host-side transpose / extra HBM round trip.
    for h in range(H):
        sl = slice(h * hd, (h + 1) * hd)
        q_ref[0, h] = qp[:, sl]
        k_ref[0, h] = kp[:, sl]
        v_ref[0, h] = vp[:, sl]


# ------------------ kernel 2: flash attention + O-proj + LN + FFN ----------- #

def _attn_ffn_kernel(q_ref, k_ref, v_ref, x_ref,
                     wo_ref, bo_ref, g1_ref, b1_ref, g2_ref, b2_ref,
                     wff1_ref, bff1_ref, wff2_ref, bff2_ref,
                     o_ref, m_sc, l_sc, acc_sc, cat_sc):
    j = pl.program_id(2)
    H, hd = acc_sc.shape[0], acc_sc.shape[2]

    @pl.when(j == 0)
    def _():
        m_sc[...] = jnp.full_like(m_sc, -jnp.inf)
        l_sc[...] = jnp.zeros_like(l_sc)
        acc_sc[...] = jnp.zeros_like(acc_sc)

    q = q_ref[0]                          # (H, tq, hd)  bf16, pre-scaled
    k = k_ref[0]                          # (H, tkv, hd) bf16
    v = v_ref[0]                          # (H, tkv, hd) bf16

    # Batched head-leading contraction on the MXU, f32 accumulation.
    s = jnp.einsum("hqd,hkd->hqk", q, k,
                   preferred_element_type=jnp.float32)       # (H, tq, tkv)

    m_prev = m_sc[...]
    m_new = jnp.maximum(m_prev, s.max(axis=-1, keepdims=True))
    alpha = jnp.exp(m_prev - m_new)
    # TODO(synk): bf16 exp on v6e/v7x (EUP throughput) once validated vs tolerance.
    p = jnp.exp(s - m_new)
    l_sc[...] = alpha * l_sc[...] + p.sum(axis=-1, keepdims=True)
    acc_sc[...] = alpha * acc_sc[...] + jnp.einsum(
        "hqk,hkd->hqd", p.astype(v.dtype), v,
        preferred_element_type=jnp.float32)                  # (H, tq, hd)
    m_sc[...] = m_new

    @pl.when(j == pl.num_programs(2) - 1)
    def _():
        # Exact softmax normalization (tiny (H, tq, 1) divide; avoids
        # compounding approx-reciprocal error through the epilogue).
        attn = acc_sc[...] / l_sc[...]                       # (H, tq, hd) f32
        # Concatenate heads along lanes once, then a single MXU matmul with
        # K = H*hd = D (replaces per-head matmuls + cross-head reduce).
        for h in range(H):
            cat_sc[:, h * hd:(h + 1) * hd] = attn[h]
        attn_out = (jnp.dot(cat_sc[...].astype(jnp.bfloat16), wo_ref[...],
                            preferred_element_type=jnp.float32)
                    + bo_ref[...])                           # (tq, D)

        x1 = _layer_norm(x_ref[0] + attn_out, g1_ref[...], b1_ref[...])

        h1 = (jnp.dot(x1.astype(jnp.bfloat16), wff1_ref[...],
                      preferred_element_type=jnp.float32) + bff1_ref[...])
        h1 = jnp.maximum(h1, 0.0)
        ff = (jnp.dot(h1.astype(jnp.bfloat16), wff2_ref[...],
                      preferred_element_type=jnp.float32) + bff2_ref[...])

        x2 = _layer_norm(x1 + ff, g2_ref[...], b2_ref[...])
        o_ref[0] = x2.astype(o_ref.dtype)


# ----------------------------- wrapper -------------------------------------- #

def transformer_block(x, params, *, num_heads):
    B, S, D = x.shape
    H = num_heads
    assert D % H == 0, "d_model must be divisible by num_heads"
    hd = D // H
    F = params["w_ff1"].shape[1]
    bf16 = jnp.bfloat16
    f32 = jnp.float32

    # Bigger q-tiles halve KV re-streaming and amortize the per-tile epilogue.
    # NOTE: keep B * n_q >= 2 for v7x megacore sharding of the "parallel" axes.
    tq = _pick_tile(S, target=256)
    tkv = _pick_tile(S, target=256)
    n_q = S // tq
    n_kv = S // tkv

    # bf16 weight copies for the MXU (f32 accumulation inside the kernels).
    wq = params["wq"].astype(bf16)
    wk = params["wk"].astype(bf16)
    wv = params["wv"].astype(bf16)
    wo = params["wo"].astype(bf16)
    wff1 = params["w_ff1"].astype(bf16)
    wff2 = params["w_ff2"].astype(bf16)

    # ---- kernel 1: fused Q/K/V projections, head-major bf16 outputs ----
    qkv_in_specs = [
        pl.BlockSpec((1, tq, D), lambda b, i: (b, i, 0)),   # x tile
        pl.BlockSpec((D, D), lambda b, i: (0, 0)),          # wq
        pl.BlockSpec((1, D), lambda b, i: (0, 0)),          # bq
        pl.BlockSpec((D, D), lambda b, i: (0, 0)),          # wk
        pl.BlockSpec((1, D), lambda b, i: (0, 0)),          # bk
        pl.BlockSpec((D, D), lambda b, i: (0, 0)),          # wv
        pl.BlockSpec((1, D), lambda b, i: (0, 0)),          # bv
    ]
    qkv_out_spec = pl.BlockSpec((1, H, tq, hd), lambda b, i: (b, 0, i, 0))
    head_shape = jax.ShapeDtypeStruct((B, H, S, hd), bf16)

    qkv_block_bytes = 2 * (                                  # default 2x buffering
        _nbytes((tq, D), f32)
        + 3 * (_nbytes((D, D), bf16) + _nbytes((1, D), f32))
        + 3 * _nbytes((H, tq, hd), bf16)
    )

    q, k, v = pl.pallas_call(
        _qkv_kernel,
        out_shape=(head_shape, head_shape, head_shape),
        grid_spec=pltpu.PrefetchScalarGridSpec(
            num_scalar_prefetch=0,
            grid=(B, n_q),
            in_specs=qkv_in_specs,
            out_specs=(qkv_out_spec, qkv_out_spec, qkv_out_spec),
        ),
        compiler_params=pltpu.CompilerParams(
            dimension_semantics=("parallel", "parallel"),
            vmem_limit_bytes=_vmem_limit(qkv_block_bytes),
        ),
    )(x, wq, params["bq"], wk, params["bk"], wv, params["bv"])

    # ---- kernel 2: flash attention + O-proj + LN1 + FFN + LN2 ----
    head_q_spec = pl.BlockSpec((1, H, tq, hd), lambda b, i, j: (b, 0, i, 0))
    head_kv_spec = pl.BlockSpec((1, H, tkv, hd), lambda b, i, j: (b, 0, j, 0))
    res_spec = pl.BlockSpec((1, tq, D), lambda b, i, j: (b, i, 0))

    def w_full(shape):
        # TODO(synk): on v7x demote these constant-index blocks to single
        # buffering (pl.Buffered(1)) or split the epilogue into its own call.
        return pl.BlockSpec(shape, lambda b, i, j: tuple(0 for _ in shape))

    attn_in_specs = [
        head_q_spec, head_kv_spec, head_kv_spec, res_spec,
        w_full((D, D)), w_full((1, D)),          # wo, bo
        w_full((1, D)), w_full((1, D)),          # gamma1, beta1
        w_full((1, D)), w_full((1, D)),          # gamma2, beta2
        w_full((D, F)), w_full((1, F)),          # w_ff1, b_ff1
        w_full((F, D)), w_full((1, D)),          # w_ff2, b_ff2
    ]

    attn_block_bytes = (
        2 * (_nbytes((H, tq, hd), bf16) + 2 * _nbytes((H, tkv, hd), bf16)
             + _nbytes((tq, D), f32)                            # residual x
             + _nbytes((D, D), bf16) + _nbytes((D, F), bf16) + _nbytes((F, D), bf16)
             + _nbytes((1, F), f32) + 6 * _nbytes((1, D), f32)
             + _nbytes((tq, D), f32))                           # output
        + 2 * _nbytes((H, tq, 1), f32)                          # m, l scratch
        + _nbytes((H, tq, hd), f32)                             # acc scratch
        + _nbytes((tq, D), f32)                                 # concat scratch
        + _nbytes((tq, F), f32)                                 # FFN hidden act
    )

    out = pl.pallas_call(
        _attn_ffn_kernel,
        out_shape=jax.ShapeDtypeStruct((B, S, D), x.dtype),
        grid_spec=pltpu.PrefetchScalarGridSpec(
            num_scalar_prefetch=0,
            grid=(B, n_q, n_kv),
            in_specs=attn_in_specs,
            out_specs=pl.BlockSpec((1, tq, D), lambda b, i, j: (b, i, 0)),
            scratch_shapes=[
                pltpu.VMEM((H, tq, 1), f32),     # running max
                pltpu.VMEM((H, tq, 1), f32),     # running denom
                pltpu.VMEM((H, tq, hd), f32),    # output accumulator
                pltpu.VMEM((tq, D), f32),        # concatenated heads
            ],
        ),
        compiler_params=pltpu.CompilerParams(
            dimension_semantics=("parallel", "parallel", "arbitrary"),
            vmem_limit_bytes=_vmem_limit(attn_block_bytes),
        ),
    )(q, k, v, x,
      wo, params["bo"],
      params["gamma1"], params["beta1"], params["gamma2"], params["beta2"],
      wff1, params["b_ff1"], wff2, params["b_ff2"])
    return out


# ----------------------------- reference & test ----------------------------- #

def _reference(x, p, num_heads):
    """Pure-JAX f32 reference of the PyTorch forward (eval mode)."""
    B, S, D = x.shape
    hd = D // num_heads

    def ln(y, g, b, eps=1e-5):
        mu = jnp.mean(y, -1, keepdims=True)
        var = jnp.mean((y - mu) ** 2, -1, keepdims=True)
        return (y - mu) / jnp.sqrt(var + eps) * g + b

    q = x @ p["wq"] + p["bq"]
    k = x @ p["wk"] + p["bk"]
    v = x @ p["wv"] + p["bv"]
    q = q.reshape(B, S, num_heads, hd).transpose(0, 2, 1, 3)
    k = k.reshape(B, S, num_heads, hd).transpose(0, 2, 1, 3)
    v = v.reshape(B, S, num_heads, hd).transpose(0, 2, 1, 3)
    scores = jnp.einsum("bhqd,bhkd->bhqk", q, k) / math.sqrt(hd)
    attn = jax.nn.softmax(scores, axis=-1)
    out = jnp.einsum("bhqk,bhkd->bhqd", attn, v)
    out = out.transpose(0, 2, 1, 3).reshape(B, S, D)
    out = out @ p["wo"] + p["bo"]
    x1 = ln(x + out, p["gamma1"], p["beta1"])
    ff = jnp.maximum(x1 @ p["w_ff1"] + p["b_ff1"], 0.0) @ p["w_ff2"] + p["b_ff2"]
    return ln(x1 + ff, p["gamma2"], p["beta2"])


def init_params(key, d_model, dim_feedforward):
    ks = jax.random.split(key, 12)
    u = lambda k, shape, fan_in: jax.random.uniform(
        k, shape, jnp.float32, -1.0 / math.sqrt(fan_in), 1.0 / math.sqrt(fan_in)
    )
    D, F = d_model, dim_feedforward
    return {
        "wq": u(ks[0], (D, D), D), "bq": u(ks[1], (1, D), D),
        "wk": u(ks[2], (D, D), D), "bk": u(ks[3], (1, D), D),
        "wv": u(ks[4], (D, D), D), "bv": u(ks[5], (1, D), D),
        "wo": u(ks[6], (D, D), D), "bo": u(ks[7], (1, D), D),
        "gamma1": jnp.ones((1, D), jnp.float32), "beta1": jnp.zeros((1, D), jnp.float32),
        "gamma2": jnp.ones((1, D), jnp.float32), "beta2": jnp.zeros((1, D), jnp.float32),
        "w_ff1": u(ks[8], (D, F), D), "b_ff1": u(ks[9], (1, F), D),
        "w_ff2": u(ks[10], (F, D), F), "b_ff2": u(ks[11], (1, D), F),
    }


if __name__ == "__main__":
    B, S, D, H, FF = 2, 8, 32, 4, 64

    key = jax.random.PRNGKey(0)
    kx, kp = jax.random.split(key)
    x = jax.random.normal(kx, (B, S, D), jnp.float32)
    params = init_params(kp, D, FF)

    out = jax.block_until_ready(transformer_block(x, params, num_heads=H))
    ref = jax.block_until_ready(_reference(x, params, H))

    # bf16 MXU operands loosen agreement vs the f32 reference.
    np.testing.assert_allclose(np.asarray(out), np.asarray(ref), rtol=5e-2, atol=5e-2)

    print("KERNEL_OK")
</pallas_src>

<mosaic_0001>
module attributes {stable_mosaic.version = 11 : i64} {
  func.func @_qkv_kernel(%arg0: i32, %arg1: i32, %arg2: memref<1x8x32xf32, #tpu.memory_space<vmem>>, %arg3: memref<32x32xbf16, #tpu.memory_space<vmem>>, %arg4: memref<1x32xf32, #tpu.memory_space<vmem>>, %arg5: memref<32x32xbf16, #tpu.memory_space<vmem>>, %arg6: memref<1x32xf32, #tpu.memory_space<vmem>>, %arg7: memref<32x32xbf16, #tpu.memory_space<vmem>>, %arg8: memref<1x32xf32, #tpu.memory_space<vmem>>, %arg9: memref<1x4x8x8xbf16, #tpu.memory_space<vmem>>, %arg10: memref<1x4x8x8xbf16, #tpu.memory_space<vmem>>, %arg11: memref<1x4x8x8xbf16, #tpu.memory_space<vmem>>) attributes {dimension_semantics = [#tpu.dimension_semantics<parallel>, #tpu.dimension_semantics<parallel>], iteration_bounds = array<i64: 2, 1>, scalar_prefetch = 0 : i64, scratch_operands = 0 : i64, tpu.core_type = #tpu.core_type<tc>, window_params = [{transform_indices = @transform_0, window_bounds = array<i64: 1, 8, 32>}, {pipeline_mode = #tpu.pipeline_mode<synchronous>, transform_indices = @transform_1, window_bounds = array<i64: 32, 32>}, {pipeline_mode = #tpu.pipeline_mode<synchronous>, transform_indices = @transform_2, window_bounds = array<i64: 1, 32>}, {pipeline_mode = #tpu.pipeline_mode<synchronous>, transform_indices = @transform_3, window_bounds = array<i64: 32, 32>}, {pipeline_mode = #tpu.pipeline_mode<synchronous>, transform_indices = @transform_4, window_bounds = array<i64: 1, 32>}, {pipeline_mode = #tpu.pipeline_mode<synchronous>, transform_indices = @transform_5, window_bounds = array<i64: 32, 32>}, {pipeline_mode = #tpu.pipeline_mode<synchronous>, transform_indices = @transform_6, window_bounds = array<i64: 1, 32>}, {transform_indices = @transform_7, window_bounds = array<i64: 1, 4, 8, 8>}, {transform_indices = @transform_8, window_bounds = array<i64: 1, 4, 8, 8>}, {transform_indices = @transform_9, window_bounds = array<i64: 1, 4, 8, 8>}]} {
    %c0 = arith.constant 0 : index
    %c0_0 = arith.constant 0 : index
    %c0_1 = arith.constant 0 : index
    %0 = vector.load %arg2[%c0, %c0_0, %c0_1] : memref<1x8x32xf32, #tpu.memory_space<vmem>>, vector<1x8x32xf32>
    %1 = vector.shape_cast %0 : vector<1x8x32xf32> to vector<8x32xf32>
    %2 = arith.truncf %1 : vector<8x32xf32> to vector<8x32xbf16>
    %c0_2 = arith.constant 0 : index
    %c0_3 = arith.constant 0 : index
    %3 = vector.load %arg3[%c0_2, %c0_3] : memref<32x32xbf16, #tpu.memory_space<vmem>>, vector<32x32xbf16>
    %cst = arith.constant dense<0.000000e+00> : vector<8x32xf32>
    %4 = tpu.matmul %2, %3, %cst {dimension_numbers = #tpu.dot_dimension_numbers<[1], [0], [0], [1], [0, 0, 1, 1], [], []>} : vector<8x32xbf16>, vector<32x32xbf16>, vector<8x32xf32> -> vector<8x32xf32>
    %c0_4 = arith.constant 0 : index
    %c0_5 = arith.constant 0 : index
    %5 = vector.load %arg4[%c0_4, %c0_5] : memref<1x32xf32, #tpu.memory_space<vmem>>, vector<1x32xf32>
    %6 = vector.broadcast %5 : vector<1x32xf32> to vector<8x32xf32>
    %7 = arith.addf %4, %6 : vector<8x32xf32>
    %cst_6 = arith.constant 0.353553385 : f32
    %8 = vector.broadcast %cst_6 : f32 to vector<8x32xf32>
    %9 = arith.mulf %7, %8 : vector<8x32xf32>
    %10 = arith.truncf %9 : vector<8x32xf32> to vector<8x32xbf16>
    %c0_7 = arith.constant 0 : index
    %c0_8 = arith.constant 0 : index
    %11 = vector.load %arg5[%c0_7, %c0_8] : memref<32x32xbf16, #tpu.memory_space<vmem>>, vector<32x32xbf16>
    %cst_9 = arith.constant dense<0.000000e+00> : vector<8x32xf32>
    %12 = tpu.matmul %2, %11, %cst_9 {dimension_numbers = #tpu.dot_dimension_numbers<[1], [0], [0], [1], [0, 0, 1, 1], [], []>} : vector<8x32xbf16>, vector<32x32xbf16>, vector<8x32xf32> -> vector<8x32xf32>
    %c0_10 = arith.constant 0 : index
    %c0_11 = arith.constant 0 : index
    %13 = vector.load %arg6[%c0_10, %c0_11] : memref<1x32xf32, #tpu.memory_space<vmem>>, vector<1x32xf32>
    %14 = vector.broadcast %13 : vector<1x32xf32> to vector<8x32xf32>
    %15 = arith.addf %12, %14 : vector<8x32xf32>
    %16 = arith.truncf %15 : vector<8x32xf32> to vector<8x32xbf16>
    %c0_12 = arith.constant 0 : index
    %c0_13 = arith.constant 0 : index
    %17 = vector.load %arg7[%c0_12, %c0_13] : memref<32x32xbf16, #tpu.memory_space<vmem>>, vector<32x32xbf16>
    %cst_14 = arith.constant dense<0.000000e+00> : vector<8x32xf32>
    %18 = tpu.matmul %2, %17, %cst_14 {dimension_numbers = #tpu.dot_dimension_numbers<[1], [0], [0], [1], [0, 0, 1, 1], [], []>} : vector<8x32xbf16>, vector<32x32xbf16>, vector<8x32xf32> -> vector<8x32xf32>
    %c0_15 = arith.constant 0 : index
    %c0_16 = arith.constant 0 : index
    %19 = vector.load %arg8[%c0_15, %c0_16] : memref<1x32xf32, #tpu.memory_space<vmem>>, vector<1x32xf32>
    %20 = vector.broadcast %19 : vector<1x32xf32> to vector<8x32xf32>
    %21 = arith.addf %18, %20 : vector<8x32xf32>
    %22 = arith.truncf %21 : vector<8x32xf32> to vector<8x32xbf16>
    %23 = vector.extract_strided_slice %10 {offsets = [0, 0], sizes = [8, 8], strides = [1, 1]} : vector<8x32xbf16> to vector<8x8xbf16>
    %c0_17 = arith.constant 0 : index
    %c0_18 = arith.constant 0 : index
    %c0_19 = arith.constant 0 : index
    %c0_20 = arith.constant 0 : index
    %24 = vector.load %arg9[%c0_17, %c0_18, %c0_19, %c0_20] : memref<1x4x8x8xbf16, #tpu.memory_space<vmem>>, vector<1x1x8x8xbf16>
    %25 = vector.shape_cast %24 : vector<1x1x8x8xbf16> to vector<8x8xbf16>
    %26 = vector.shape_cast %23 : vector<8x8xbf16> to vector<1x1x8x8xbf16>
    tpu.vector_store %arg9[%c0_17, %c0_18, %c0_19, %c0_20], %26 {strides = array<i32>} : memref<1x4x8x8xbf16, #tpu.memory_space<vmem>>, vector<1x1x8x8xbf16>,
    %27 = vector.extract_strided_slice %16 {offsets = [0, 0], sizes = [8, 8], strides = [1, 1]} : vector<8x32xbf16> to vector<8x8xbf16>
    %c0_21 = arith.constant 0 : index
    %c0_22 = arith.constant 0 : index
    %c0_23 = arith.constant 0 : index
    %c0_24 = arith.constant 0 : index
    %28 = vector.load %arg10[%c0_21, %c0_22, %c0_23, %c0_24] : memref<1x4x8x8xbf16, #tpu.memory_space<vmem>>, vector<1x1x8x8xbf16>
    %29 = vector.shape_cast %28 : vector<1x1x8x8xbf16> to vector<8x8xbf16>
    %30 = vector.shape_cast %27 : vector<8x8xbf16> to vector<1x1x8x8xbf16>
    tpu.vector_store %arg10[%c0_21, %c0_22, %c0_23, %c0_24], %30 {strides = array<i32>} : memref<1x4x8x8xbf16, #tpu.memory_space<vmem>>, vector<1x1x8x8xbf16>,
    %31 = vector.extract_strided_slice %22 {offsets = [0, 0], sizes = [8, 8], strides = [1, 1]} : vector<8x32xbf16> to vector<8x8xbf16>
    %c0_25 = arith.constant 0 : index
    %c0_26 = arith.constant 0 : index
    %c0_27 = arith.constant 0 : index
    %c0_28 = arith.constant 0 : index
    %32 = vector.load %arg11[%c0_25, %c0_26, %c0_27, %c0_28] : memref<1x4x8x8xbf16, #tpu.memory_space<vmem>>, vector<1x1x8x8xbf16>
    %33 = vector.shape_cast %32 : vector<1x1x8x8xbf16> to vector<8x8xbf16>
    %34 = vector.shape_cast %31 : vector<8x8xbf16> to vector<1x1x8x8xbf16>
    tpu.vector_store %arg11[%c0_25, %c0_26, %c0_27, %c0_28], %34 {strides = array<i32>} : memref<1x4x8x8xbf16, #tpu.memory_space<vmem>>, vector<1x1x8x8xbf16>,
    %35 = vector.extract_strided_slice %10 {offsets = [0, 8], sizes = [8, 8], strides = [1, 1]} : vector<8x32xbf16> to vector<8x8xbf16>
    %c0_29 = arith.constant 0 : index
    %c1 = arith.constant 1 : index
    %c0_30 = arith.constant 0 : index
    %c0_31 = arith.constant 0 : index
    %36 = vector.load %arg9[%c0_29, %c1, %c0_30, %c0_31] : memref<1x4x8x8xbf16, #tpu.memory_space<vmem>>, vector<1x1x8x8xbf16>
    %37 = vector.shape_cast %36 : vector<1x1x8x8xbf16> to vector<8x8xbf16>
    %38 = vector.shape_cast %35 : vector<8x8xbf16> to vector<1x1x8x8xbf16>
    tpu.vector_store %arg9[%c0_29, %c1, %c0_30, %c0_31], %38 {strides = array<i32>} : memref<1x4x8x8xbf16, #tpu.memory_space<vmem>>, vector<1x1x8x8xbf16>,
    %39 = vector.extract_strided_slice %16 {offsets = [0, 8], sizes = [8, 8], strides = [1, 1]} : vector<8x32xbf16> to vector<8x8xbf16>
    %c0_32 = arith.constant 0 : index
    %c1_33 = arith.constant 1 : index
    %c0_34 = arith.constant 0 : index
    %c0_35 = arith.constant 0 : index
    %40 = vector.load %arg10[%c0_32, %c1_33, %c0_34, %c0_35] : memref<1x4x8x8xbf16, #tpu.memory_space<vmem>>, vector<1x1x8x8xbf16>
    %41 = vector.shape_cast %40 : vector<1x1x8x8xbf16> to vector<8x8xbf16>
    %42 = vector.shape_cast %39 : vector<8x8xbf16> to vector<1x1x8x8xbf16>
    tpu.vector_store %arg10[%c0_32, %c1_33, %c0_34, %c0_35], %42 {strides = array<i32>} : memref<1x4x8x8xbf16, #tpu.memory_space<vmem>>, vector<1x1x8x8xbf16>,
    %43 = vector.extract_strided_slice %22 {offsets = [0, 8], sizes = [8, 8], strides = [1, 1]} : vector<8x32xbf16> to vector<8x8xbf16>
    %c0_36 = arith.constant 0 : index
    %c1_37 = arith.constant 1 : index
    %c0_38 = arith.constant 0 : index
    %c0_39 = arith.constant 0 : index
    %44 = vector.load %arg11[%c0_36, %c1_37, %c0_38, %c0_39] : memref<1x4x8x8xbf16, #tpu.memory_space<vmem>>, vector<1x1x8x8xbf16>
    %45 = vector.shape_cast %44 : vector<1x1x8x8xbf16> to vector<8x8xbf16>
    %46 = vector.shape_cast %43 : vector<8x8xbf16> to vector<1x1x8x8xbf16>
    tpu.vector_store %arg11[%c0_36, %c1_37, %c0_38, %c0_39], %46 {strides = array<i32>} : memref<1x4x8x8xbf16, #tpu.memory_space<vmem>>, vector<1x1x8x8xbf16>,
    %47 = vector.extract_strided_slice %10 {offsets = [0, 16], sizes = [8, 8], strides = [1, 1]} : vector<8x32xbf16> to vector<8x8xbf16>
    %c0_40 = arith.constant 0 : index
    %c2 = arith.constant 2 : index
    %c0_41 = arith.constant 0 : index
    %c0_42 = arith.constant 0 : index
    %48 = vector.load %arg9[%c0_40, %c2, %c0_41, %c0_42] : memref<1x4x8x8xbf16, #tpu.memory_space<vmem>>, vector<1x1x8x8xbf16>
    %49 = vector.shape_cast %48 : vector<1x1x8x8xbf16> to vector<8x8xbf16>
    %50 = vector.shape_cast %47 : vector<8x8xbf16> to vector<1x1x8x8xbf16>
    tpu.vector_store %arg9[%c0_40, %c2, %c0_41, %c0_42], %50 {strides = array<i32>} : memref<1x4x8x8xbf16, #tpu.memory_space<vmem>>, vector<1x1x8x8xbf16>,
    %51 = vector.extract_strided_slice %16 {offsets = [0, 16], sizes = [8, 8], strides = [1, 1]} : vector<8x32xbf16> to vector<8x8xbf16>
    %c0_43 = arith.constant 0 : index
    %c2_44 = arith.constant 2 : index
    %c0_45 = arith.constant 0 : index
    %c0_46 = arith.constant 0 : index
    %52 = vector.load %arg10[%c0_43, %c2_44, %c0_45, %c0_46] : memref<1x4x8x8xbf16, #tpu.memory_space<vmem>>, vector<1x1x8x8xbf16>
    %53 = vector.shape_cast %52 : vector<1x1x8x8xbf16> to vector<8x8xbf16>
    %54 = vector.shape_cast %51 : vector<8x8xbf16> to vector<1x1x8x8xbf16>
    tpu.vector_store %arg10[%c0_43, %c2_44, %c0_45, %c0_46], %54 {strides = array<i32>} : memref<1x4x8x8xbf16, #tpu.memory_space<vmem>>, vector<1x1x8x8xbf16>,
    %55 = vector.extract_strided_slice %22 {offsets = [0, 16], sizes = [8, 8], strides = [1, 1]} : vector<8x32xbf16> to vector<8x8xbf16>
    %c0_47 = arith.constant 0 : index
    %c2_48 = arith.constant 2 : index
    %c0_49 = arith.constant 0 : index
    %c0_50 = arith.constant 0 : index
    %56 = vector.load %arg11[%c0_47, %c2_48, %c0_49, %c0_50] : memref<1x4x8x8xbf16, #tpu.memory_space<vmem>>, vector<1x1x8x8xbf16>
    %57 = vector.shape_cast %56 : vector<1x1x8x8xbf16> to vector<8x8xbf16>
    %58 = vector.shape_cast %55 : vector<8x8xbf16> to vector<1x1x8x8xbf16>
    tpu.vector_store %arg11[%c0_47, %c2_48, %c0_49, %c0_50], %58 {strides = array<i32>} : memref<1x4x8x8xbf16, #tpu.memory_space<vmem>>, vector<1x1x8x8xbf16>,
    %59 = vector.extract_strided_slice %10 {offsets = [0, 24], sizes = [8, 8], strides = [1, 1]} : vector<8x32xbf16> to vector<8x8xbf16>
    %c0_51 = arith.constant 0 : index
    %c3 = arith.constant 3 : index
    %c0_52 = arith.constant 0 : index
    %c0_53 = arith.constant 0 : index
    %60 = vector.load %arg9[%c0_51, %c3, %c0_52, %c0_53] : memref<1x4x8x8xbf16, #tpu.memory_space<vmem>>, vector<1x1x8x8xbf16>
    %61 = vector.shape_cast %60 : vector<1x1x8x8xbf16> to vector<8x8xbf16>
    %62 = vector.shape_cast %59 : vector<8x8xbf16> to vector<1x1x8x8xbf16>
    tpu.vector_store %arg9[%c0_51, %c3, %c0_52, %c0_53], %62 {strides = array<i32>} : memref<1x4x8x8xbf16, #tpu.memory_space<vmem>>, vector<1x1x8x8xbf16>,
    %63 = vector.extract_strided_slice %16 {offsets = [0, 24], sizes = [8, 8], strides = [1, 1]} : vector<8x32xbf16> to vector<8x8xbf16>
    %c0_54 = arith.constant 0 : index
    %c3_55 = arith.constant 3 : index
    %c0_56 = arith.constant 0 : index
    %c0_57 = arith.constant 0 : index
    %64 = vector.load %arg10[%c0_54, %c3_55, %c0_56, %c0_57] : memref<1x4x8x8xbf16, #tpu.memory_space<vmem>>, vector<1x1x8x8xbf16>
    %65 = vector.shape_cast %64 : vector<1x1x8x8xbf16> to vector<8x8xbf16>
    %66 = vector.shape_cast %63 : vector<8x8xbf16> to vector<1x1x8x8xbf16>
    tpu.vector_store %arg10[%c0_54, %c3_55, %c0_56, %c0_57], %66 {strides = array<i32>} : memref<1x4x8x8xbf16, #tpu.memory_space<vmem>>, vector<1x1x8x8xbf16>,
    %67 = vector.extract_strided_slice %22 {offsets = [0, 24], sizes = [8, 8], strides = [1, 1]} : vector<8x32xbf16> to vector<8x8xbf16>
    %c0_58 = arith.constant 0 : index
    %c3_59 = arith.constant 3 : index
    %c0_60 = arith.constant 0 : index
    %c0_61 = arith.constant 0 : index
    %68 = vector.load %arg11[%c0_58, %c3_59, %c0_60, %c0_61] : memref<1x4x8x8xbf16, #tpu.memory_space<vmem>>, vector<1x1x8x8xbf16>
    %69 = vector.shape_cast %68 : vector<1x1x8x8xbf16> to vector<8x8xbf16>
    %70 = vector.shape_cast %67 : vector<8x8xbf16> to vector<1x1x8x8xbf16>
    tpu.vector_store %arg11[%c0_58, %c3_59, %c0_60, %c0_61], %70 {strides = array<i32>} : memref<1x4x8x8xbf16, #tpu.memory_space<vmem>>, vector<1x1x8x8xbf16>,
    return
  }
  func.func @transform_0(%arg0: i32, %arg1: i32) -> (i32, i32, i32) {
    %c0_i32 = arith.constant 0 : i32
    %c0_i32_0 = arith.constant 0 : i32
    return %arg0, %arg1, %c0_i32 : i32, i32, i32
  }
  func.func @transform_1(%arg0: i32, %arg1: i32) -> (i32, i32) {
    %c0_i32 = arith.constant 0 : i32
    %c0_i32_0 = arith.constant 0 : i32
    %c0_i32_1 = arith.constant 0 : i32
    return %c0_i32, %c0_i32_0 : i32, i32
  }
  func.func @transform_2(%arg0: i32, %arg1: i32) -> (i32, i32) {
    %c0_i32 = arith.constant 0 : i32
    %c0_i32_0 = arith.constant 0 : i32
    %c0_i32_1 = arith.constant 0 : i32
    return %c0_i32, %c0_i32_0 : i32, i32
  }
  func.func @transform_3(%arg0: i32, %arg1: i32) -> (i32, i32) {
    %c0_i32 = arith.constant 0 : i32
    %c0_i32_0 = arith.constant 0 : i32
    %c0_i32_1 = arith.constant 0 : i32
    return %c0_i32, %c0_i32_0 : i32, i32
  }
  func.func @transform_4(%arg0: i32, %arg1: i32) -> (i32, i32) {
    %c0_i32 = arith.constant 0 : i32
    %c0_i32_0 = arith.constant 0 : i32
    %c0_i32_1 = arith.constant 0 : i32
    return %c0_i32, %c0_i32_0 : i32, i32
  }
  func.func @transform_5(%arg0: i32, %arg1: i32) -> (i32, i32) {
    %c0_i32 = arith.constant 0 : i32
    %c0_i32_0 = arith.constant 0 : i32
    %c0_i32_1 = arith.constant 0 : i32
    return %c0_i32, %c0_i32_0 : i32, i32
  }
  func.func @transform_6(%arg0: i32, %arg1: i32) -> (i32, i32) {
    %c0_i32 = arith.constant 0 : i32
    %c0_i32_0 = arith.constant 0 : i32
    %c0_i32_1 = arith.constant 0 : i32
    return %c0_i32, %c0_i32_0 : i32, i32
  }
  func.func @transform_7(%arg0: i32, %arg1: i32) -> (i32, i32, i32, i32) {
    %c0_i32 = arith.constant 0 : i32
    %c0_i32_0 = arith.constant 0 : i32
    %c0_i32_1 = arith.constant 0 : i32
    return %arg0, %c0_i32, %arg1, %c0_i32_0 : i32, i32, i32, i32
  }
  func.func @transform_8(%arg0: i32, %arg1: i32) -> (i32, i32, i32, i32) {
    %c0_i32 = arith.constant 0 : i32
    %c0_i32_0 = arith.constant 0 : i32
    %c0_i32_1 = arith.constant 0 : i32
    return %arg0, %c0_i32, %arg1, %c0_i32_0 : i32, i32, i32, i32
  }
  func.func @transform_9(%arg0: i32, %arg1: i32) -> (i32, i32, i32, i32) {
    %c0_i32 = arith.constant 0 : i32
    %c0_i32_0 = arith.constant 0 : i32
    %c0_i32_1 = arith.constant 0 : i32
    return %arg0, %c0_i32, %arg1, %c0_i32_0 : i32, i32, i32, i32
  }
}

</mosaic_0001>

<bundles_post_ra>
// kernel: tpu_custom_call.1
= control target key start
LH: loop header
LB: loop body
LE: loop exit
PB: predicated region body
PF: predicated region fallthrough
CT: control target
= control target key end

     0   :  { %s1783_s0 = inlined_call_operand.hbm [shape: f32[2,8,32], index: 0, kind: input, shape index: {}]   ;;  %s1784_s1 = inlined_call_operand.hbm [shape: bf16[32,32], index: 1, kind: input, shape index: {}]   ;;  %s1785_s2 = inlined_call_operand.vmem [shape: f32[1,32], index: 2, kind: input, shape index: {}]   ;;  %s1786_s3 = inlined_call_operand.hbm [shape: bf16[32,32], index: 3, kind: input, shape index: {}]   ;;  %s1787_s4 = inlined_call_operand.vmem [shape: f32[1,32], index: 4, kind: input, shape index: {}]   ;;  %s1788_s5 = inlined_call_operand.vmem [shape: bf16[32,32], index: 5, kind: input, shape index: {}]   ;;  %s1789_s6 = inlined_call_operand.vmem [shape: f32[1,32], index: 6, kind: input, shape index: {}]   ;;  %s1790_s7 = inlined_call_operand.hbm [shape: bf16[2,4,8,8], index: 7, kind: output, shape index: {0}]   ;;  %s1791_s8 = inlined_call_operand.hbm [shape: bf16[2,4,8,8], index: 8, kind: output, shape index: {1}]   ;;  %s1792_s9 = inlined_call_operand.hbm [shape: bf16[2,4,8,8], index: 9, kind: output, shape index: {2}]  }
   0x1   :  { %1802 = sst [smem:[#allocation18_spill]] %s1792_s9 }
   0x2   :  { %15 = vsyncpa [#allocation3], 0 }
   0x3   :  { %17 = vsyncpa [#allocation3 + $0x1], 0 }
   0x4   :  { %18 = vsyncpa [#allocation6], 0 }
   0x5   :  { %19 = vsyncpa [#allocation4], 0 }
   0x6   :  { %21 = vsyncpa [#allocation4 + $0x1], 0 }
   0x7   :  { %22 = vsyncpa [#allocation10], 0 }
   0x8   :  { %24 = vsyncpa [#allocation10 + $0x1], 0  ;;  %s1397_s30 = smov 0   ;;  %s1399_s10 = smov 0  }
   0x9   :  { %s1401_s11 = smov 0   ;;  %s1403_s12 = smov 0  }
   0xa   :  { %s1405_s13 = smov 0   ;;  %s1407_s14 = smov 0  }
   0xb LB: > { %1803 = sst [smem:[#allocation16_spill]] %s1310_s30  ;;  %s1428_s15 = sadd.s32 4294967295, %s1330_s14   ;;  %s1330_s14 = sphi %s1407_s14, %s30_s14   ;;  %s1326_s13 = sphi %s1405_s13, %s1829_s13   ;;  %s1322_s12 = sphi %s1403_s12, %s1828_s12   ;;  %s1318_s11 = sphi %s1401_s11, %s1827_s11   ;;  %s1314_s10 = sphi %s1399_s10, %s1826_s10   ;;  %s1310_s30 = sphi %s1397_s30, %s1825_s30  }
   0xc   : > { %s1793_s16 = sadd.s32 4294967294, %s1330_s14   ;;  %p64_p0 = scmp.ne.s32.totalorder %s1314_s10, %s1310_s30 }
   0xd   : > { %p1794_p1 = scmp.eq.s32.totalorder %s1428_s15, 0  ;;  %p222_p3 = scmp.eq.s32.totalorder %s1793_s16, 1 }
   0xe   : > { %p903_p5 = scmp.ge.s32.totalorder %s1330_s14, 1  ;;  %p285_p7 = scmp.lt.s32.totalorder %s1330_s14, 3 }
   0xf   : > { %p1439_p4 = por %p1794_p1, %p64_p0  ;;  %p1444_p6 = por %p222_p3, %p64_p0 }
  0x10   : > { %p1449_p8 = pnand %p903_p5, %p285_p7  ;;  %s1332_s20 = smov [#allocation5]  }
  0x11   : > { %s1804_s17 = scalar_select %p1439_p4, 1, 0 }
  0x12   : > { %s1805_s18 = scalar_select %p1444_p6, 1, 0 }
  0x13   : > { %s297_s21 = sshll.u32 %s1332_s20, 4  ;;  %p1006_p9 = pneg %p1449_p8  ;;  %s1453_s21 = int_to_ptr.vmem [resolvable:$true] %s297_s21 }
  0x14   : > { %1806 = sst [smem:[#allocation17_spill]] %s1805_s18  ;;  %s1333_s23 = smov [#allocation7]  }
  0x15   : > { %p1460_p11 = pnand %p1006_p9, %p1794_p1  ;;  %s313_s24 = sshll.u32 %s1333_s23, 4  ;;  %s1464_s24 = int_to_ptr.vmem [resolvable:$true] %s313_s24 }
  0x16   : > { %s1098_s27 = scalar_lea.hbm %s1784_s1, 256 }
  0x17   : > { %p1099_p12 = scmp.ne.s32.totalorder %s1784_s1, %s1098_s27  ;;  %p1100_p13 = pneg %p1460_p11 }
  0x18   : > { %p1105_p5 = scmp.lt.u32.totalorder %s1098_s27, %s1784_s1 }
  0x19   : > { %p1101_p0 = pnand %p1100_p13, %p1099_p12 }
  0x1b   : > { %p1102_p3 = pneg %p1101_p0 }
  0x1d   : > { %p1107_p7 = pnand %p1105_p5, %p1102_p3 }
  0x1f   : > { %1110 = shalt.err (!%p1107_p7)
}
  0x20   : > { %s1111_s23 = scalar_lea.vmem %s1453_s21, 256  ;;  %p1119_p2 = scmp.lt.s32.totalorder %s1453_s21, %s1453_s21 }
  0x21   : > { %p1112_p9 = scmp.ne.s32.totalorder %s1453_s21, %s1111_s23  ;;  %p1120_p12 = scmp.lt.s32.totalorder %s1111_s23, %s1111_s23 }
  0x23   : > { %p1114_p10 = pnand %p1112_p9, %p1100_p13  ;;  %p1121_p0 = por %p1120_p12, %p1119_p2 }
  0x25   : > { %p1115_p1 = pneg %p1114_p10 }
  0x27   : > { %p1122_p6 = pnand %p1121_p0, %p1115_p1 }
  0x29   : > { %1125 = shalt.err (!%p1122_p6)
}
  0x2a   : > { %s1334_s16 = smov 64   ;;  %s1335_s25 = smov 4  }
  0x2b   : > { %1009 = dma.hbm_to_vmem [thread:$0]  (!%p1460_p11), %s1784_s1, 256, %s1453_s21, [#allocation6], %s1334_s16, %s1334_s16, %s1335_s25  }
  0x2c   : > { %s1126_s20 = scalar_lea.hbm %s1786_s3, 256 }
  0x2d   : > { %p1127_p2 = scmp.ne.s32.totalorder %s1786_s3, %s1126_s20  ;;  %p1133_p10 = scmp.lt.u32.totalorder %s1126_s20, %s1786_s3 }
  0x2f   : > { %p1129_p1 = pnand %p1127_p2, %p1100_p13 }
  0x31   : > { %p1130_p6 = pneg %p1129_p1 }
  0x33   : > { %p1135_p3 = pnand %p1133_p10, %p1130_p6 }
  0x35   : > { %1138 = shalt.err (!%p1135_p3)
}
  0x36   : > { %s1139_s21 = scalar_lea.vmem %s1464_s24, 256  ;;  %p1147_p12 = scmp.lt.s32.totalorder %s1464_s24, %s1464_s24 }
  0x37   : > { %p1140_p5 = scmp.ne.s32.totalorder %s1464_s24, %s1139_s21  ;;  %p1148_p0 = scmp.lt.s32.totalorder %s1139_s21, %s1139_s21 }
  0x39   : > { %p1142_p7 = pnand %p1140_p5, %p1100_p13  ;;  %p1149_p2 = por %p1148_p0, %p1147_p12 }
  0x3b   : > { %p1143_p9 = pneg %p1142_p7 }
  0x3d   : > { %p1150_p1 = pnand %p1149_p2, %p1143_p9 }
  0x3f   : > { %1153 = shalt.err (!%p1150_p1)
}
  0x40   : > { %1012 = dma.hbm_to_vmem [thread:$0]  (!%p1460_p11), %s1786_s3, 256, %s1464_s24, [#allocation6], %s1334_s16, %s1334_s16, %s1335_s25  }
  0x41   : > { %s42_s18 = sadd.s32 1, %s1326_s13  ;;  %s51_s26 = sadd.s32 1, %s1318_s11 }
  0x42   : > { %p44_p13 = scmp.ge.s32.totalorder %s42_s18, 2  ;;  %p58_p6 = scmp.ne.s32.totalorder %s1318_s11, %s1314_s10 }
  0x43   : > { %p59_p10 = scmp.eq.s32.totalorder %s1330_s14, 0  ;;  %p1029_p3 = scmp.lt.s32.totalorder %s1330_s14, 2 }
  0x44   : > { %s1831_s18 = smov (%p44_p13, %s42_s18), 0  ;;  %p1809_p7 = scmp.eq.s32.totalorder %s1428_s15, 1 }
  0x45   : > { %p60_p5 = por %p59_p10, %p58_p6  ;;  %s46_s27 = ssub.s32 %s1326_s13, %s1831_s18 }
  0x46   : > { %p1528_p9 = por %p1809_p7, %p58_p6  ;;  %s336_s28 = sand.u32 1, %s1318_s11  }
  0x47   : > { %p49_p12 = scmp.eq.s32.totalorder %s46_s27, 0  ;;  %s907_s24 = sshll.u32 %s336_s28, 3 }
  0x48   : > { %s1810_s22 = scalar_select %p1528_p9, 1, 0 }
  0x49   : > { %s908_s16 = sshll.u32 %s1326_s13, 7  ;;  %s340_s21 = scalar_lea.vmem [#allocation2], %s907_s24 }
  0x4a   : > { %s1537_s25 = scalar_select %p49_p12, %s1318_s11, %s51_s26  }
  0x4b   : > { %s1542_s23 = scalar_lea.hbm %s1783_s0, %s908_s16  ;;  %s348_s9 = sshll.u32 %s340_s21, 4  ;;  %s1550_s9 = int_to_ptr.vmem [resolvable:$true] %s348_s9 }
  0x4c   : > { %p1546_p11 = pnand %p1029_p3, %p60_p5  ;;  %s337_s26 = scalar_lea.sflag [#allocation3], %s336_s28 }
  0x4d   : > { %s1154_s27 = scalar_lea.hbm %s1542_s23, 128  ;;  %s1159_s29 = scalar_lea.hbm %s1783_s0, 256 }
  0x4e   : > { %p1155_p0 = scmp.ne.s32.totalorder %s1542_s23, %s1154_s27  ;;  %p1156_p2 = pneg %p1546_p11 }
  0x4f   : > { %p1160_p6 = scmp.lt.u32.totalorder %s1542_s23, %s1783_s0  ;;  %p1161_p10 = scmp.lt.u32.totalorder %s1159_s29, %s1154_s27 }
  0x50   : > { %p1157_p1 = pnand %p1156_p2, %p1155_p0  ;;  %p1163_p5 = scmp.lt.u32.totalorder %s1154_s27, %s1542_s23 }
  0x51   : > { %p1162_p3 = por %p1161_p10, %p1160_p6 }
  0x52   : > { %p1158_p13 = pneg %p1157_p1 }
  0x53   : > { %p1164_p7 = por %p1163_p5, %p1162_p3 }
  0x55   : > { %p1165_p12 = pnand %p1164_p7, %p1158_p13 }
  0x57   : > { %1168 = shalt.err (!%p1165_p12)
}
  0x58   : > { %s1169_s28 = scalar_lea.vmem %s1550_s9, 128  ;;  %s1336_s24 = smov [#allocation2]  }
  0x59   : > { %p1170_p0 = scmp.ne.s32.totalorder %s1550_s9, %s1169_s28  ;;  %s1174_s16 = sshll.u32 %s1336_s24, 4  ;;  %s1175_s16 = int_to_ptr.vmem [resolvable:$false] %s1174_s16 }
  0x5a   : > { %s1176_s20 = scalar_lea.vmem %s1175_s16, 256  ;;  %p1177_p4 = scmp.lt.s32.totalorder %s1550_s9, %s1175_s16 }
  0x5b   : > { %p1172_p1 = pnand %p1170_p0, %p1156_p2  ;;  %p1178_p6 = scmp.lt.s32.totalorder %s1176_s20, %s1169_s28 }
  0x5d   : > { %p1173_p9 = pneg %p1172_p1  ;;  %p1179_p10 = por %p1178_p6, %p1177_p4 }
  0x5f   : > { %p1180_p3 = pnand %p1179_p10, %p1173_p9 }
  0x61   : > { %1183 = shalt.err (!%p1180_p3)
}
  0x62   : > { %1016 = dma.hbm_to_vmem [thread:$0]  (!%p1546_p11), %s1542_s23, 128, %s1550_s9, %s337_s26  }
  0x63   : > { %357 = sbr.rel (%p1449_p8) target bundleno = 518 (0x206), region = 48  ;;  %s1580_s27 = sand.u32 (!%p1449_p8), 1, %s1314_s10  }
  0x64   : > { %s910_s29 = sshll.u32 (!%p1449_p8), %s1580_s27, 3  ;;  %s360_s21 = scalar_lea.sflag (!%p1449_p8), [#allocation3], %s1580_s27 }
  0x65   : > { %s363_s28 = scalar_lea.vmem (!%p1449_p8), [#allocation2], %s910_s29  ;;  %p1812_p4 = scmp.ne.s32.totalorder (!%p1449_p8), %s1804_s17, 0 }
  0x6a   : > { %1293 = dma.done.wait (%p1812_p4), %s360_s21, 128  }
  0x6b   : > { %1295 = vsyncadd (%p1812_p4), %s360_s21, 4294967168  ;;  %p1813_p9 = scmp.eq.s32.totalorder %s1428_s15, 0 }
  0x6d   : > { %1297 = dma.done.wait (%p1813_p9), [#allocation6], 512   ;;  %p1814_p11 = pmov %p1813_p9 }
  0x6e   : > { %v1337_v0 = vmov 0.0   ;;  %vm1338_vm0 = vmmov 0   ;;  %v1092_v1 = vld [vmem:[#allocation5] sm:$0xff]   ;;  %v1093_v2 = vld [vmem:[#allocation7] sm:$0xff]   ;;  %v1094_v3 = vld [vmem:[#allocation5 + $0x8] sm:$0xff]   ;;  %vm442_vm1 = vcmask 261120  }
  0x6f   : > { %1299 = vsyncadd (%p1814_p11), [#allocation6], 4294966784  ;;  %966 = vmatprep.subr.bf16.mxu0 %v1337_v0  ;;  %974 = vmatprep.subr.bf16.mxu1 %v1337_v0  ;;  %v1095_v4 = vld [vmem:[#allocation7 + $0x8] sm:$0xff]   ;;  %v1096_v7 = vld [vmem:[%s1788_s5] sm:$0xff]   ;;  %s1605_s24 = sshll.u32 %s1580_s27, 4  ;;  %vm616_vm2 = vcmask 60416  }
  0x70   : > { %970 = vmatprep.mubr.msk.bf16.mxu0 %vm1338_vm0, %v1337_v0  ;;  %978 = vmatprep.mubr.msk.bf16.mxu1 %vm1338_vm0, %v1337_v0  ;;  %v417_v5 = vld [vmem:[%s363_s28] sm:$0xff]  ;;  %s1611_s29 = scalar_lea.vmem [#allocation9], %s1605_s24  ;;  %s1339_s21 = smov 104  }
  0x71   : > { %967 = vmatpush3.bf16.msra.mxu0 %v1092_v1  ;;  %975 = vmatpush3.bf16.msra.mxu1 %v1093_v2  ;;  %v418_v6 = vpack.c.bf16 %v417_v5, %v417_v5  ;;  %v1097_v8 = vld [vmem:[%s1788_s5 + $0x8] sm:$0xff]   ;;  %v916_v9 = vld [vmem:[%s1785_s2] ss:$0 sm:$0xff]  ;;  %s1340_s28 = smov 120   ;;  %s1619_s23 = scalar_lea.vmem [#allocation8], %s1605_s24 }
  0x72   : > { %968 = vmatprep.subr.bf16.mxu0 %v1337_v0  ;;  %976 = vmatprep.subr.bf16.mxu1 %v1337_v0  ;;  %v920_v10 = vld [vmem:[%s1787_s4] ss:$0 sm:$0xff]  ;;  %s1341_s9 = smov 112   ;;  %s1624_s30 = scalar_lea.vmem [#allocation11], %s1605_s24 }
  0x73   : > { %v924_v24 = vld [vmem:[%s1789_s6] ss:$0 sm:$0xff]  ;;  %s716_s26 = sshll.u32 %s1611_s29, 4  ;;  %s679_s16 = sand.u32 1, %s1428_s15   ;;  %s1633_s26 = int_to_ptr.vmem [resolvable:$true] %s716_s26 }
  0x74   : > { %s1631_s20 = sshll.u32 %s1322_s12, 8  ;;  %s1649_s12 = scalar_lea.sflag [#allocation10], %s679_s16 }
  0x75   : > { %969 = vmatpush3.bf16.msra.mxu0 %v1094_v3  ;;  %977 = vmatpush3.bf16.msra.mxu1 %v1095_v4  ;;  %s1184_s15 = scalar_lea.vmem %s1633_s26, 256  ;;  %p1815_p2 = scmp.ne.s32.totalorder %s1810_s22, 0 }
  0x76   : > { %982 = vmatprep.subr.bf16.mxu0 %v1337_v0  ;;  %p1185_p8 = scmp.ne.s32.totalorder %s1633_s26, %s1184_s15  ;;  %s1342_s17 = smov [#allocation9]  }
  0x77   : > { %s1188_s19 = sshll.u32 %s1342_s17, 4  ;;  %s1189_s19 = int_to_ptr.vmem [resolvable:$false] %s1188_s19 }
  0x78   : > { %971 = vmatmul.mubr.msk.bf16.vlgmr.msra.gmra.mrb[0].mxu0 %vm442_vm1, %v418_v6  ;;  %979 = vmatmul.mubr.msk.bf16.vlgmr.msra.gmra.mrb[0].mxu1 %vm442_vm1, %v418_v6  ;;  %p1186_p13 = pnand %p1185_p8, %p1815_p2  ;;  %p1191_p7 = scmp.lt.s32.totalorder %s1633_s26, %s1189_s19 }
  0x79   : > { %983 = vmatpush3.bf16.msra.mxu0 %v1096_v7  ;;  %986 = vmatprep.mubr.msk.bf16.mxu0 %vm1338_vm0, %v1337_v0 }
  0x7a   : > { %984 = vmatprep.subr.bf16.mxu0 %v1337_v0  ;;  %p1187_p5 = pneg %p1186_p13 }
  0x7d   : > { %985 = vmatpush3.bf16.msra.mxu0 %v1097_v8 }
  0x80   : > { %987 = vmatmul.mubr.msk.bf16.vlgmr.msra.gmra.mrb[4].mxu0 %vm442_vm1, %v418_v6 }
 0x14b   : > { %v480_v11 = vpop.f32.mrb[0].mxu0  ;;  %v545_v13 = vpop.f32.mrb[0].mxu1 }
 0x14c   : > { %v481_v12 = vadd.f32 %v916_v9, %v480_v11  ;;  %v972_v14 = vpop.f32.mrb[1].mxu0  ;;  %v546_v15 = vadd.f32 %v920_v10, %v545_v13  ;;  %v980_v16 = vpop.f32.mrb[1].mxu1 }
 0x14d   : > { %v483_v17 = vpop.f32.mrb[2].mxu0  ;;  %v548_v19 = vpop.f32.mrb[2].mxu1 }
 0x14e   : > { %v486_v18 = vmul.f32 0.35355338, %v481_v12  ;;  %v973_v20 = vpop.f32.mrb[3].mxu0  ;;  %v551_v21 = vpack.c.bf16 %v546_v15, %v546_v15  ;;  %v981_v22 = vpop.f32.mrb[3].mxu1 }
 0x150   : > { %v487_v23 = vpack.c.bf16 %v486_v18, %v486_v18  ;;  %618 = vst.msk [vmem:[%s1611_s29] sm:$0xf] %vm616_vm2, %v551_v21  ;;  %664 = vrot.lane.b32.xlu1 %v551_v21, %s1339_s21  ;;  %631 = vrot.lane.b32.xlu0 %v551_v21, %s1340_s28 }
 0x152   : > { %617 = vst.msk [vmem:[%s1619_s23] sm:$0xf] %vm616_vm2, %v487_v23 }
 0x153   : > { %v609_v25 = vpop.f32.mrb[4].mxu0 }
 0x154   : > { %v610_v26 = vadd.f32 %v924_v24, %v609_v25  ;;  %v988_v27 = vpop.f32.mrb[5].mxu0  ;;  %649 = vrot.lane.b32.xlu0 %v551_v21, %s1341_s9  ;;  %623 = vrot.lane.b32.xlu1 %v487_v23, %s1340_s28 }
 0x155   : > { %v612_v28 = vpop.f32.mrb[6].mxu0 }
 0x156   : > { %v615_v29 = vpack.c.bf16 %v610_v26, %v610_v26  ;;  %v989_v30 = vpop.f32.mrb[7].mxu0 }
 0x158   : > { %619 = vst.msk [vmem:[%s1624_s30] sm:$0xf] %vm616_vm2, %v615_v29  ;;  %644 = vrot.lane.b32.xlu1 %v487_v23, %s1341_s9  ;;  %639 = vrot.lane.b32.xlu0 %v615_v29, %s1340_s28 }
 0x15c   : > { %659 = vrot.lane.b32.xlu1 %v487_v23, %s1339_s21  ;;  %654 = vrot.lane.b32.xlu0 %v615_v29, %s1341_s9  ;;  %s1190_s9 = scalar_lea.vmem %s1189_s19, 512 }
 0x15d   : > { %p1192_p12 = scmp.lt.s32.totalorder %s1190_s9, %s1184_s15 }
 0x15f   : > { %p1193_p0 = por %p1192_p12, %p1191_p7 }
 0x160   : > { %669 = vrot.lane.b32.xlu0 %v615_v29, %s1339_s21  ;;  %s1643_s21 = scalar_lea.hbm %s1791_s8, %s1631_s20 }
 0x161   : > { %p1194_p1 = pnand %p1193_p0, %p1187_p5 }
 0x1c2   : > { %v665_v31 = vpop.permute.xlu1 %664  ;;  %v632_v32 = vpop.permute.xlu0 %631 }
 0x1c3   : > { %938 = vst.msk [vmem:[%s1611_s29 + $0xc] sm:$0xf] %vm616_vm2, %v665_v31  ;;  %931 = vst.msk [vmem:[%s1611_s29 + $0x4] sm:$0xf] %vm616_vm2, %v632_v32 }
 0x1c6   : > { %v650_v33 = vpop.permute.xlu0 %649  ;;  %v624_v34 = vpop.permute.xlu1 %623 }
 0x1c7   : > { %935 = vst.msk [vmem:[%s1611_s29 + $0x8] sm:$0xf] %vm616_vm2, %v650_v33  ;;  %929 = vst.msk [vmem:[%s1619_s23 + $0x4] sm:$0xf] %vm616_vm2, %v624_v34 }
 0x1c8   : > { %1197 = shalt.err (!%p1194_p1)
}
 0x1c9   : > { %s1198_s29 = scalar_lea.hbm %s1643_s21, 256  ;;  %s1202_s28 = scalar_lea.hbm %s1791_s8, 512 }
 0x1ca   : > { %p1199_p6 = scmp.ne.s32.totalorder %s1643_s21, %s1198_s29  ;;  %p1203_p4 = scmp.lt.u32.totalorder %s1643_s21, %s1791_s8 }
 0x1cb   : > { %p1204_p9 = scmp.lt.u32.totalorder %s1202_s28, %s1198_s29  ;;  %p1206_p8 = scmp.lt.u32.totalorder %s1198_s29, %s1643_s21 }
 0x1cc   : > { %p1200_p10 = pnand %p1199_p6, %p1815_p2 }
 0x1cd   : > { %p1205_p11 = por %p1204_p9, %p1203_p4 }
 0x1ce   : > { %p1201_p3 = pneg %p1200_p10 }
 0x1cf   : > { %p1207_p13 = por %p1206_p8, %p1205_p11 }
 0x1d1   : > { %p1208_p5 = pnand %p1207_p13, %p1201_p3 }
 0x1d3   : > { %1211 = shalt.err (!%p1208_p5)
}
 0x1d4   : > { %s1800_s15 = smov 64   ;;  %s1344_s9 = smov 4   ;;  %v645_v35 = vpop.permute.xlu1 %644  ;;  %v640_v36 = vpop.permute.xlu0 %639 }
 0x1d5   : > { %1001 = dma.vmem_to_hbm [thread:$0]  (%p1815_p2), %s1633_s26, 256, %s1643_s21, %s1649_s12, %s1800_s15, %s1800_s15, %s1344_s9  }
 0x1d6   : > { %s699_s29 = sshll.u32 %s1619_s23, 4  ;;  %934 = vst.msk [vmem:[%s1619_s23 + $0x8] sm:$0xf] %vm616_vm2, %v645_v35  ;;  %933 = vst.msk [vmem:[%s1624_s30 + $0x4] sm:$0xf] %vm616_vm2, %v640_v36  ;;  %s1687_s28 = scalar_lea.hbm %s1790_s7, %s1631_s20  ;;  %s1681_s29 = int_to_ptr.vmem [resolvable:$true] %s699_s29 }
 0x1d7   : > { %s1212_s21 = scalar_lea.vmem %s1681_s29, 256  ;;  %s1345_s19 = smov [#allocation8]  }
 0x1d8   : > { %v660_v37 = vpop.permute.xlu1 %659  ;;  %v655_v38 = vpop.permute.xlu0 %654  ;;  %p1213_p7 = scmp.ne.s32.totalorder %s1681_s29, %s1212_s21  ;;  %s1216_s16 = sshll.u32 %s1345_s19, 4  ;;  %s1217_s16 = int_to_ptr.vmem [resolvable:$false] %s1216_s16 }
 0x1d9   : > { %937 = vst.msk [vmem:[%s1619_s23 + $0xc] sm:$0xf] %vm616_vm2, %v660_v37  ;;  %936 = vst.msk [vmem:[%s1624_s30 + $0x8] sm:$0xf] %vm616_vm2, %v655_v38  ;;  %s1218_s24 = scalar_lea.vmem %s1217_s16, 512  ;;  %p1219_p1 = scmp.lt.s32.totalorder %s1681_s29, %s1217_s16 }
 0x1da   : > { %p1214_p12 = pnand %p1213_p7, %p1815_p2  ;;  %p1220_p6 = scmp.lt.s32.totalorder %s1218_s24, %s1212_s21 }
 0x1dc   : > { %p1215_p0 = pneg %p1214_p12  ;;  %p1221_p10 = por %p1220_p6, %p1219_p1 }
 0x1de   : > { %p1222_p3 = pnand %p1221_p10, %p1215_p0 }
 0x1e0   : > { %1225 = shalt.err (!%p1222_p3)
}
 0x1e1   : > { %s1226_s23 = scalar_lea.hbm %s1687_s28, 256  ;;  %s1230_s19 = scalar_lea.hbm %s1790_s7, 512 }
 0x1e2   : > { %p1227_p4 = scmp.ne.s32.totalorder %s1687_s28, %s1226_s23  ;;  %p1231_p8 = scmp.lt.u32.totalorder %s1687_s28, %s1790_s7 }
 0x1e3   : > { %p1232_p13 = scmp.lt.u32.totalorder %s1230_s19, %s1226_s23  ;;  %p1234_p7 = scmp.lt.u32.totalorder %s1226_s23, %s1687_s28 }
 0x1e4   : > { %p1228_p9 = pnand %p1227_p4, %p1815_p2 }
 0x1e5   : > { %p1233_p5 = por %p1232_p13, %p1231_p8 }
 0x1e6   : > { %p1229_p11 = pneg %p1228_p9 }
 0x1e7   : > { %p1235_p12 = por %p1234_p7, %p1233_p5 }
 0x1e9   : > { %p1236_p0 = pnand %p1235_p12, %p1229_p11 }
 0x1eb   : > { %1239 = shalt.err (!%p1236_p0)
}
 0x1ec   : > { %s1816_s21 = smov 64   ;;  %s1817_s24 = scalar_lea.sflag [#allocation4], %s1580_s27  ;;  %v670_v39 = vpop.permute.xlu0 %669 }
 0x1ed   : > { %1000 = dma.vmem_to_hbm [thread:$0]  (%p1815_p2), %s1681_s29, 256, %s1687_s28, %s1817_s24, %s1816_s21, %s1816_s21, %s1344_s9  }
 0x1ee   : > { %s1818_s15 = sshll.u32 %s1624_s30, 4  ;;  %s1819_s23 = sld [smem:[#allocation18_spill]]  ;;  %939 = vst.msk [vmem:[%s1624_s30 + $0xc] sm:$0xf] %vm616_vm2, %v670_v39  ;;  %s1723_s15 = int_to_ptr.vmem [resolvable:$true] %s1818_s15 }
 0x1ef   : > { %s1240_s27 = scalar_lea.vmem %s1723_s15, 256  ;;  %s1346_s29 = smov [#allocation11]  }
 0x1f0   : > { %p1241_p1 = scmp.ne.s32.totalorder %s1723_s15, %s1240_s27  ;;  %s1244_s28 = sshll.u32 %s1346_s29, 4  ;;  %s1245_s28 = int_to_ptr.vmem [resolvable:$false] %s1244_s28 }
 0x1f1   : > { %s1246_s16 = scalar_lea.vmem %s1245_s28, 512  ;;  %p1247_p3 = scmp.lt.s32.totalorder %s1723_s15, %s1245_s28 }
 0x1f2   : > { %p1242_p6 = pnand %p1241_p1, %p1815_p2  ;;  %p1248_p4 = scmp.lt.s32.totalorder %s1246_s16, %s1240_s27 }
 0x1f4   : > { %s1729_s19 = scalar_lea.hbm %s1819_s23, %s1631_s20  ;;  %p1243_p10 = pneg %p1242_p6 }
 0x1f5   : > { %p1249_p9 = por %p1248_p4, %p1247_p3 }
 0x1f7   : > { %p1250_p11 = pnand %p1249_p9, %p1243_p10 }
 0x1f9   : > { %1253 = shalt.err (!%p1250_p11)
}
 0x1fa   : > { %s1254_s30 = scalar_lea.hbm %s1729_s19, 256  ;;  %s1258_s17 = scalar_lea.hbm %s1819_s23, 512 }
 0x1fb   : > { %p1255_p8 = scmp.ne.s32.totalorder %s1729_s19, %s1254_s30  ;;  %p1259_p7 = scmp.lt.u32.totalorder %s1729_s19, %s1819_s23 }
 0x1fc   : > { %p1260_p12 = scmp.lt.u32.totalorder %s1258_s17, %s1254_s30  ;;  %p1262_p1 = scmp.lt.u32.totalorder %s1254_s30, %s1729_s19 }
 0x1fd   : > { %p1256_p13 = pnand %p1255_p8, %p1815_p2 }
 0x1fe   : > { %p1261_p0 = por %p1260_p12, %p1259_p7 }
 0x1ff   : > { %p1257_p5 = pneg %p1256_p13 }
 0x200   : > { %p1263_p6 = por %p1262_p1, %p1261_p0 }
 0x202   : > { %p1264_p10 = pnand %p1263_p6, %p1257_p5 }
 0x204   : > { %1267 = shalt.err (!%p1264_p10)
}
 0x205   : > { %1002 = dma.vmem_to_hbm [thread:$0]  (%p1815_p2), %s1723_s15, 256, %s1729_s19, %s1649_s12, %s1816_s21, %s1816_s21, %s1344_s9  }
 0x206 PF: > { %s1820_s27 = sld [smem:[#allocation16_spill]]  ;;  %s1821_s28 = sld [smem:[#allocation17_spill]] }
 0x207   : > { %p1823_p4 = scmp.ge.s32.totalorder %s1330_s14, 2 }
 0x20c   : > { %s748_s16 = sand.u32 1, %s1820_s27   ;;  %p1822_p3 = scmp.ne.s32.totalorder %s1821_s28, 0 }
 0x20d   : > { %s749_s30 = scalar_lea.sflag [#allocation4], %s748_s16 }
 0x20e   : > { %p1018_p9 = pnand %p1823_p4, %p1822_p3 }
 0x210   : > { %1301 = dma.done.wait (!%p1018_p9), %s749_s30, 256  }
 0x211   : > { %1303 = vsyncadd (!%p1018_p9), %s749_s30, 4294967040  ;;  %s1824_s22 = sadd.s32 4294967294, %s1330_s14  }
 0x212   : > { %s757_s20 = sand.u32 1, %s1824_s22  }
 0x213   : > { %s758_s24 = scalar_lea.sflag [#allocation10], %s757_s20 }
 0x214   : > { %1305 = dma.done.wait (!%p1018_p9), %s758_s24, 512  }
 0x215   : > { %1307 = vsyncadd (!%p1018_p9), %s758_s24, 4294966784  ;;  %s30_s14 = sadd.s32 1, %s1330_s14   ;;  %s1825_s30 = smov %s1314_s10 }
 0x216   : > { %p27_p2 = scmp.ge.s32.totalorder %s30_s14, 4   ;;  %s1826_s10 = smov %s1318_s11 }
 0x217   : > { %s1827_s11 = smov %s1537_s25  ;;  %s1828_s12 = smov %s1326_s13 }
 0x218   : > { %s1829_s13 = smov %s1831_s18  ;;  %29 = sbr.rel (!%p27_p2) target bundleno = 11 (0xb), region = 142 }
 0x21f   :  { %772 = vsyncpa [#allocation3], 1 }
 0x220   :  { %774 = vsyncpa [#allocation3 + $0x1], 1 }
 0x221   :  { %775 = vsyncpa [#allocation6], 1 }
 0x222   :  { %776 = vsyncpa [#allocation4], 1 }
 0x223   :  { %778 = vsyncpa [#allocation4 + $0x1], 1 }
 0x224   :  { %779 = vsyncpa [#allocation10], 1 }
 0x225   :  { %781 = vsyncpa [#allocation10 + $0x1], 1 }

</bundles_post_ra>
